<compile_context>
chip_gen: v7x
topology: tpu7x:2x2x1
jax: 0.10.0
libtpu: 0.0.40
codegen_flags: <defaults>
</compile_context>

<pallas_src>
import functools

import jax
import jax.numpy as jnp
from jax.experimental import pallas as pl
from jax.experimental.pallas import tpu as pltpu

NEAR_Z = 0.01
FAR_Z = 100.0        # unused in the forward pass, kept for module parity
LANES = 128
TILE_S = 512         # sublane rows per grid step -> 512 * 128 = 65536 vertices


def _project_kernel(mat_ref, v_ref, screen_ref, depth_ref, mask_ref, *, near_z):
    """One grid step over (TILE_S * 128) vertices.

    mat_ref:    (4, 4) f32 in SMEM (scalar prefetch).  Composed matrix M with
                [s0*w, s1*w, z, w] = [x, y, z, w] @ M.
    v_ref:      (4, TILE_S, 128) f32 vertex components (x, y, z, w planes).
    screen_ref: (2, TILE_S, 128) f32 -> s0, s1.
    depth_ref:  (TILE_S, 128) f32    -> raw depth (clip-space z).
    mask_ref:   (TILE_S, 128) int8   -> 0/1 inclusion mask.
    """
    x = v_ref[0]
    y = v_ref[1]
    z = v_ref[2]
    w = v_ref[3]

    def col(j):
        # Scalar-broadcast FMAs on the VPU (4x4 matrix stays in SMEM; the
        # tiny matmul would waste the MXU).
        return (mat_ref[0, j] * x + mat_ref[1, j] * y
                + mat_ref[2, j] * z + mat_ref[3, j] * w)

    s0n = col(0)          # s0 * w_clip
    s1n = col(1)          # s1 * w_clip
    zc = col(2)           # clip-space z (raw depth)
    wc = col(3)           # clip-space w

    # EUP approximate reciprocal + one Newton-Raphson refinement.
    r = pl.reciprocal(wc, approx=True)
    inv_w = r * (2.0 - wc * r)

    s0 = s0n * inv_w
    s1 = s1n * inv_w
    mask = (s0 > 0.0) & (s0 < 1.0) & (s1 > 0.0) & (s1 < 1.0) & (zc > near_z)

    screen_ref[0] = s0
    screen_ref[1] = s1
    depth_ref[...] = zc
    mask_ref[...] = mask.astype(jnp.int8)


def project_vertices_lane_major(v_slab, view_matrix, proj_matrix, near_z=NEAR_Z):
    """Zero-extra-copy core.

    v_slab: (4, S, 128) f32 component-major vertices (vertex i = column
            (i // 128, i % 128) of each component plane).
    Returns (screen (2, S, 128) f32, depth (S, 128) f32, mask (S, 128) int8).
    """
    _, s, lanes = v_slab.shape
    assert lanes == LANES

    # Fold the proj-space -> screen-space affine into the matrix:
    #   s0 = (-y/w + 1) * 0.5 = (-0.5*y + 0.5*w) / w
    #   s1 = ( x/w + 1) * 0.5 = ( 0.5*x + 0.5*w) / w
    post = jnp.array([[0.0, 0.5, 0.0, 0.0],
                      [-0.5, 0.0, 0.0, 0.0],
                      [0.0, 0.0, 1.0, 0.0],
                      [0.5, 0.5, 0.0, 1.0]], dtype=jnp.float32)
    mat = (view_matrix.astype(jnp.float32)
           @ proj_matrix.astype(jnp.float32) @ post)

    tile_s = s if s <= TILE_S else TILE_S      # multiple of 8 or full extent
    grid = (pl.cdiv(s, tile_s),)
    kernel = functools.partial(_project_kernel, near_z=near_z)

    screen, depth, mask = pl.pallas_call(
        kernel,
        out_shape=(
            jax.ShapeDtypeStruct((2, s, LANES), jnp.float32),
            jax.ShapeDtypeStruct((s, LANES), jnp.float32),
            jax.ShapeDtypeStruct((s, LANES), jnp.int8),
        ),
        grid_spec=pltpu.PrefetchScalarGridSpec(
            num_scalar_prefetch=1,             # composed 4x4 matrix -> SMEM
            grid=grid,
            in_specs=[pl.BlockSpec((4, tile_s, LANES),
                                   lambda i, *_: (0, i, 0))],
            out_specs=(
                pl.BlockSpec((2, tile_s, LANES), lambda i, *_: (0, i, 0)),
                pl.BlockSpec((tile_s, LANES), lambda i, *_: (i, 0)),
                pl.BlockSpec((tile_s, LANES), lambda i, *_: (i, 0)),
            ),
        ),
        compiler_params=pltpu.CompilerParams(
            dimension_semantics=("parallel",)),
    )(mat, v_slab)
    return screen, depth, mask


def project_vertices(vertices, view_matrix, proj_matrix,
                     near_z=NEAR_Z, far_z=FAR_Z):
    """Pallas equivalent of ProjectVertices.forward (PyTorch interface).

    Args:
      vertices:    (N, 4) float32 homogeneous vertices.
      view_matrix: (4, 4) float32.
      proj_matrix: (4, 4) float32.
    Returns:
      (vertices_screen (N, 2) f32, raw_depth (N,) f32, exclude_mask (N,) bool)

    NOTE: the (N,4)<->lane-major transposes here exist only for interface
    parity with the PyTorch module; performance-critical callers should feed
    and consume the lane-major layout via project_vertices_lane_major().
    """
    del far_z  # not used in the forward pass
    n = vertices.shape[0]
    n_pad = ((n + LANES - 1) // LANES) * LANES
    s = n_pad // LANES

    vt = vertices.astype(jnp.float32).T                 # (4, N) component-major
    if n_pad != n:
        vt = jnp.pad(vt, ((0, 0), (0, n_pad - n)))      # pad lanes (w = 0)
    v_slab = vt.reshape(4, s, LANES)

    screen_lm, depth_lm, mask_lm = project_vertices_lane_major(
        v_slab, view_matrix, proj_matrix, near_z)

    vertices_screen = screen_lm.reshape(2, n_pad)[:, :n].T   # (N, 2)
    raw_depth = depth_lm.reshape(n_pad)[:n]                  # (N,)
    exclude_mask = mask_lm.reshape(n_pad)[:n] != 0           # (N,) bool
    return vertices_screen, raw_depth, exclude_mask


def _reference(vertices, view_matrix, proj_matrix, near_z=NEAR_Z):
    v_proj = (vertices @ view_matrix) @ proj_matrix
    s0 = (-v_proj[:, 1] / v_proj[:, 3] + 1.0) * 0.5
    s1 = (v_proj[:, 0] / v_proj[:, 3] + 1.0) * 0.5
    screen = jnp.stack([s0, s1], axis=1)
    mask = (s0 > 0) & (s0 < 1) & (s1 > 0) & (s1 < 1) & (v_proj[:, 2] > near_z)
    return screen, v_proj[:, 2], mask


if __name__ == "__main__":
    key = jax.random.PRNGKey(0)
    k_v, k_view, k_proj = jax.random.split(key, 3)

    # Deterministic near-identity "view"/"projection" matrices.
    view_matrix = (jnp.eye(4, dtype=jnp.float32)
                   + 0.05 * jax.random.normal(k_view, (4, 4), jnp.float32))
    proj_matrix = (jnp.eye(4, dtype=jnp.float32)
                   + 0.05 * jax.random.normal(k_proj, (4, 4), jnp.float32))

    # One partial single-tile case and one 2-step grid with a ragged tail
    # (the 2-step grid exercises the "parallel" axis, e.g. both v7x cores).
    for n_vertices in (1000, TILE_S * LANES + 123):
        xyz = jax.random.normal(k_v, (n_vertices, 3), dtype=jnp.float32)
        vertices = jnp.concatenate(
            [xyz, jnp.ones((n_vertices, 1), dtype=jnp.float32)], axis=1)

        screen, depth, mask = project_vertices(vertices, view_matrix,
                                               proj_matrix)
        jax.block_until_ready((screen, depth, mask))

        ref_screen, ref_depth, ref_mask = _reference(vertices, view_matrix,
                                                     proj_matrix)

        assert screen.shape == (n_vertices, 2) and screen.dtype == jnp.float32
        assert depth.shape == (n_vertices,)
        assert mask.shape == (n_vertices,) and mask.dtype == jnp.bool_
        # Composed-matrix + approx-reciprocal(+NR) math: observed error is
        # ~1e-7 relative; allow a slightly looser bound than exact 1e-5.
        assert jnp.allclose(screen, ref_screen, atol=2e-5, rtol=2e-5)
        assert jnp.allclose(depth, ref_depth, atol=2e-5, rtol=2e-5)
        # Mask must agree except for vertices numerically on a threshold.
        s0r, s1r = ref_screen[:, 0], ref_screen[:, 1]
        tol = 1e-4
        boundary = ((jnp.abs(s0r) < tol) | (jnp.abs(s0r - 1.0) < tol)
                    | (jnp.abs(s1r) < tol) | (jnp.abs(s1r - 1.0) < tol)
                    | (jnp.abs(ref_depth - NEAR_Z) < tol))
        assert bool(jnp.all((mask == ref_mask) | boundary))

    print("KERNEL_OK")
</pallas_src>

<mosaic_0001>
module attributes {stable_mosaic.version = 11 : i64} {
  func.func @_project_kernel(%arg0: i32, %arg1: memref<4x4xf32, #tpu.memory_space<smem>>, %arg2: memref<4x8x128xf32, #tpu.memory_space<vmem>>, %arg3: memref<2x8x128xf32, #tpu.memory_space<vmem>>, %arg4: memref<8x128xf32, #tpu.memory_space<vmem>>, %arg5: memref<8x128xi8, #tpu.memory_space<vmem>>) attributes {dimension_semantics = [#tpu.dimension_semantics<parallel>], iteration_bounds = array<i64: 1>, scalar_prefetch = 1 : i64, scratch_operands = 0 : i64, tpu.core_type = #tpu.core_type<tc>, window_params = [{transform_indices = @transform_0, window_bounds = array<i64: 4, 8, 128>}, {transform_indices = @transform_1, window_bounds = array<i64: 2, 8, 128>}, {transform_indices = @transform_2, window_bounds = array<i64: 8, 128>}, {transform_indices = @transform_3, window_bounds = array<i64: 8, 128>}]} {
    %c0 = arith.constant 0 : index
    %c0_0 = arith.constant 0 : index
    %c0_1 = arith.constant 0 : index
    %0 = vector.load %arg2[%c0, %c0_0, %c0_1] : memref<4x8x128xf32, #tpu.memory_space<vmem>>, vector<1x8x128xf32>
    %1 = vector.shape_cast %0 : vector<1x8x128xf32> to vector<8x128xf32>
    %c1 = arith.constant 1 : index
    %c0_2 = arith.constant 0 : index
    %c0_3 = arith.constant 0 : index
    %2 = vector.load %arg2[%c1, %c0_2, %c0_3] : memref<4x8x128xf32, #tpu.memory_space<vmem>>, vector<1x8x128xf32>
    %3 = vector.shape_cast %2 : vector<1x8x128xf32> to vector<8x128xf32>
    %c2 = arith.constant 2 : index
    %c0_4 = arith.constant 0 : index
    %c0_5 = arith.constant 0 : index
    %4 = vector.load %arg2[%c2, %c0_4, %c0_5] : memref<4x8x128xf32, #tpu.memory_space<vmem>>, vector<1x8x128xf32>
    %5 = vector.shape_cast %4 : vector<1x8x128xf32> to vector<8x128xf32>
    %c3 = arith.constant 3 : index
    %c0_6 = arith.constant 0 : index
    %c0_7 = arith.constant 0 : index
    %6 = vector.load %arg2[%c3, %c0_6, %c0_7] : memref<4x8x128xf32, #tpu.memory_space<vmem>>, vector<1x8x128xf32>
    %7 = vector.shape_cast %6 : vector<1x8x128xf32> to vector<8x128xf32>
    %c0_8 = arith.constant 0 : index
    %c0_9 = arith.constant 0 : index
    %8 = memref.load %arg1[%c0_8, %c0_9] : memref<4x4xf32, #tpu.memory_space<smem>>
    %9 = vector.broadcast %8 : f32 to vector<8x128xf32>
    %10 = arith.mulf %9, %1 : vector<8x128xf32>
    %c1_10 = arith.constant 1 : index
    %c0_11 = arith.constant 0 : index
    %11 = memref.load %arg1[%c1_10, %c0_11] : memref<4x4xf32, #tpu.memory_space<smem>>
    %12 = vector.broadcast %11 : f32 to vector<8x128xf32>
    %13 = arith.mulf %12, %3 : vector<8x128xf32>
    %14 = arith.addf %10, %13 : vector<8x128xf32>
    %c2_12 = arith.constant 2 : index
    %c0_13 = arith.constant 0 : index
    %15 = memref.load %arg1[%c2_12, %c0_13] : memref<4x4xf32, #tpu.memory_space<smem>>
    %16 = vector.broadcast %15 : f32 to vector<8x128xf32>
    %17 = arith.mulf %16, %5 : vector<8x128xf32>
    %18 = arith.addf %14, %17 : vector<8x128xf32>
    %c3_14 = arith.constant 3 : index
    %c0_15 = arith.constant 0 : index
    %19 = memref.load %arg1[%c3_14, %c0_15] : memref<4x4xf32, #tpu.memory_space<smem>>
    %20 = vector.broadcast %19 : f32 to vector<8x128xf32>
    %21 = arith.mulf %20, %7 : vector<8x128xf32>
    %22 = arith.addf %18, %21 : vector<8x128xf32>
    %c0_16 = arith.constant 0 : index
    %c1_17 = arith.constant 1 : index
    %23 = memref.load %arg1[%c0_16, %c1_17] : memref<4x4xf32, #tpu.memory_space<smem>>
    %24 = vector.broadcast %23 : f32 to vector<8x128xf32>
    %25 = arith.mulf %24, %1 : vector<8x128xf32>
    %c1_18 = arith.constant 1 : index
    %c1_19 = arith.constant 1 : index
    %26 = memref.load %arg1[%c1_18, %c1_19] : memref<4x4xf32, #tpu.memory_space<smem>>
    %27 = vector.broadcast %26 : f32 to vector<8x128xf32>
    %28 = arith.mulf %27, %3 : vector<8x128xf32>
    %29 = arith.addf %25, %28 : vector<8x128xf32>
    %c2_20 = arith.constant 2 : index
    %c1_21 = arith.constant 1 : index
    %30 = memref.load %arg1[%c2_20, %c1_21] : memref<4x4xf32, #tpu.memory_space<smem>>
    %31 = vector.broadcast %30 : f32 to vector<8x128xf32>
    %32 = arith.mulf %31, %5 : vector<8x128xf32>
    %33 = arith.addf %29, %32 : vector<8x128xf32>
    %c3_22 = arith.constant 3 : index
    %c1_23 = arith.constant 1 : index
    %34 = memref.load %arg1[%c3_22, %c1_23] : memref<4x4xf32, #tpu.memory_space<smem>>
    %35 = vector.broadcast %34 : f32 to vector<8x128xf32>
    %36 = arith.mulf %35, %7 : vector<8x128xf32>
    %37 = arith.addf %33, %36 : vector<8x128xf32>
    %c0_24 = arith.constant 0 : index
    %c2_25 = arith.constant 2 : index
    %38 = memref.load %arg1[%c0_24, %c2_25] : memref<4x4xf32, #tpu.memory_space<smem>>
    %39 = vector.broadcast %38 : f32 to vector<8x128xf32>
    %40 = arith.mulf %39, %1 : vector<8x128xf32>
    %c1_26 = arith.constant 1 : index
    %c2_27 = arith.constant 2 : index
    %41 = memref.load %arg1[%c1_26, %c2_27] : memref<4x4xf32, #tpu.memory_space<smem>>
    %42 = vector.broadcast %41 : f32 to vector<8x128xf32>
    %43 = arith.mulf %42, %3 : vector<8x128xf32>
    %44 = arith.addf %40, %43 : vector<8x128xf32>
    %c2_28 = arith.constant 2 : index
    %c2_29 = arith.constant 2 : index
    %45 = memref.load %arg1[%c2_28, %c2_29] : memref<4x4xf32, #tpu.memory_space<smem>>
    %46 = vector.broadcast %45 : f32 to vector<8x128xf32>
    %47 = arith.mulf %46, %5 : vector<8x128xf32>
    %48 = arith.addf %44, %47 : vector<8x128xf32>
    %c3_30 = arith.constant 3 : index
    %c2_31 = arith.constant 2 : index
    %49 = memref.load %arg1[%c3_30, %c2_31] : memref<4x4xf32, #tpu.memory_space<smem>>
    %50 = vector.broadcast %49 : f32 to vector<8x128xf32>
    %51 = arith.mulf %50, %7 : vector<8x128xf32>
    %52 = arith.addf %48, %51 : vector<8x128xf32>
    %c0_32 = arith.constant 0 : index
    %c3_33 = arith.constant 3 : index
    %53 = memref.load %arg1[%c0_32, %c3_33] : memref<4x4xf32, #tpu.memory_space<smem>>
    %54 = vector.broadcast %53 : f32 to vector<8x128xf32>
    %55 = arith.mulf %54, %1 : vector<8x128xf32>
    %c1_34 = arith.constant 1 : index
    %c3_35 = arith.constant 3 : index
    %56 = memref.load %arg1[%c1_34, %c3_35] : memref<4x4xf32, #tpu.memory_space<smem>>
    %57 = vector.broadcast %56 : f32 to vector<8x128xf32>
    %58 = arith.mulf %57, %3 : vector<8x128xf32>
    %59 = arith.addf %55, %58 : vector<8x128xf32>
    %c2_36 = arith.constant 2 : index
    %c3_37 = arith.constant 3 : index
    %60 = memref.load %arg1[%c2_36, %c3_37] : memref<4x4xf32, #tpu.memory_space<smem>>
    %61 = vector.broadcast %60 : f32 to vector<8x128xf32>
    %62 = arith.mulf %61, %5 : vector<8x128xf32>
    %63 = arith.addf %59, %62 : vector<8x128xf32>
    %c3_38 = arith.constant 3 : index
    %c3_39 = arith.constant 3 : index
    %64 = memref.load %arg1[%c3_38, %c3_39] : memref<4x4xf32, #tpu.memory_space<smem>>
    %65 = vector.broadcast %64 : f32 to vector<8x128xf32>
    %66 = arith.mulf %65, %7 : vector<8x128xf32>
    %67 = arith.addf %63, %66 : vector<8x128xf32>
    %68 = tpu.reciprocal %67 {approx = true} : vector<8x128xf32> -> vector<8x128xf32>
    %69 = arith.mulf %67, %68 : vector<8x128xf32>
    %cst = arith.constant 2.000000e+00 : f32
    %70 = vector.broadcast %cst : f32 to vector<8x128xf32>
    %71 = arith.subf %70, %69 : vector<8x128xf32>
    %72 = arith.mulf %68, %71 : vector<8x128xf32>
    %73 = arith.mulf %22, %72 : vector<8x128xf32>
    %74 = arith.mulf %37, %72 : vector<8x128xf32>
    %cst_40 = arith.constant 0.000000e+00 : f32
    %75 = vector.broadcast %cst_40 : f32 to vector<8x128xf32>
    %76 = arith.cmpf ogt, %73, %75 : vector<8x128xf32>
    %cst_41 = arith.constant 1.000000e+00 : f32
    %77 = vector.broadcast %cst_41 : f32 to vector<8x128xf32>
    %78 = arith.cmpf olt, %73, %77 : vector<8x128xf32>
    %79 = arith.andi %76, %78 : vector<8x128xi1>
    %cst_42 = arith.constant 0.000000e+00 : f32
    %80 = vector.broadcast %cst_42 : f32 to vector<8x128xf32>
    %81 = arith.cmpf ogt, %74, %80 : vector<8x128xf32>
    %82 = arith.andi %79, %81 : vector<8x128xi1>
    %cst_43 = arith.constant 1.000000e+00 : f32
    %83 = vector.broadcast %cst_43 : f32 to vector<8x128xf32>
    %84 = arith.cmpf olt, %74, %83 : vector<8x128xf32>
    %85 = arith.andi %82, %84 : vector<8x128xi1>
    %cst_44 = arith.constant 0.00999999977 : f32
    %86 = vector.broadcast %cst_44 : f32 to vector<8x128xf32>
    %87 = arith.cmpf ogt, %52, %86 : vector<8x128xf32>
    %88 = arith.andi %85, %87 : vector<8x128xi1>
    %c0_45 = arith.constant 0 : index
    %c0_46 = arith.constant 0 : index
    %c0_47 = arith.constant 0 : index
    %89 = vector.load %arg3[%c0_45, %c0_46, %c0_47] : memref<2x8x128xf32, #tpu.memory_space<vmem>>, vector<1x8x128xf32>
    %90 = vector.shape_cast %89 : vector<1x8x128xf32> to vector<8x128xf32>
    %91 = vector.shape_cast %73 : vector<8x128xf32> to vector<1x8x128xf32>
    tpu.vector_store %arg3[%c0_45, %c0_46, %c0_47], %91 {strides = array<i32>} : memref<2x8x128xf32, #tpu.memory_space<vmem>>, vector<1x8x128xf32>,
    %c1_48 = arith.constant 1 : index
    %c0_49 = arith.constant 0 : index
    %c0_50 = arith.constant 0 : index
    %92 = vector.load %arg3[%c1_48, %c0_49, %c0_50] : memref<2x8x128xf32, #tpu.memory_space<vmem>>, vector<1x8x128xf32>
    %93 = vector.shape_cast %92 : vector<1x8x128xf32> to vector<8x128xf32>
    %94 = vector.shape_cast %74 : vector<8x128xf32> to vector<1x8x128xf32>
    tpu.vector_store %arg3[%c1_48, %c0_49, %c0_50], %94 {strides = array<i32>} : memref<2x8x128xf32, #tpu.memory_space<vmem>>, vector<1x8x128xf32>,
    %c0_51 = arith.constant 0 : index
    %c0_52 = arith.constant 0 : index
    %95 = vector.load %arg4[%c0_51, %c0_52] : memref<8x128xf32, #tpu.memory_space<vmem>>, vector<8x128xf32>
    tpu.vector_store %arg4[%c0_51, %c0_52], %52 {strides = array<i32>} : memref<8x128xf32, #tpu.memory_space<vmem>>, vector<8x128xf32>,
    %96 = arith.extui %88 : vector<8x128xi1> to vector<8x128xi8>
    %c0_53 = arith.constant 0 : index
    %c0_54 = arith.constant 0 : index
    %97 = vector.load %arg5[%c0_53, %c0_54] : memref<8x128xi8, #tpu.memory_space<vmem>>, vector<8x128xi8>
    tpu.vector_store %arg5[%c0_53, %c0_54], %96 {strides = array<i32>} : memref<8x128xi8, #tpu.memory_space<vmem>>, vector<8x128xi8>,
    return
  }
  func.func @transform_0(%arg0: i32, %arg1: memref<4x4xf32, #tpu.memory_space<smem>>) -> (i32, i32, i32) {
    %c0_i32 = arith.constant 0 : i32
    %c0_i32_0 = arith.constant 0 : i32
    %c0_i32_1 = arith.constant 0 : i32
    return %c0_i32, %arg0, %c0_i32_0 : i32, i32, i32
  }
  func.func @transform_1(%arg0: i32, %arg1: memref<4x4xf32, #tpu.memory_space<smem>>) -> (i32, i32, i32) {
    %c0_i32 = arith.constant 0 : i32
    %c0_i32_0 = arith.constant 0 : i32
    %c0_i32_1 = arith.constant 0 : i32
    return %c0_i32, %arg0, %c0_i32_0 : i32, i32, i32
  }
  func.func @transform_2(%arg0: i32, %arg1: memref<4x4xf32, #tpu.memory_space<smem>>) -> (i32, i32) {
    %c0_i32 = arith.constant 0 : i32
    %c0_i32_0 = arith.constant 0 : i32
    return %arg0, %c0_i32 : i32, i32
  }
  func.func @transform_3(%arg0: i32, %arg1: memref<4x4xf32, #tpu.memory_space<smem>>) -> (i32, i32) {
    %c0_i32 = arith.constant 0 : i32
    %c0_i32_0 = arith.constant 0 : i32
    return %arg0, %c0_i32 : i32, i32
  }
}

</mosaic_0001>

<bundles_post_ra>
// kernel: tpu_custom_call.1
= control target key start
LH: loop header
LB: loop body
LE: loop exit
PB: predicated region body
PF: predicated region fallthrough
CT: control target
= control target key end

     0   :  { %s442_s0 = inlined_call_operand.hbm [shape: f32[4,4], index: 0, kind: input, shape index: {}]   ;;  %s443_s1 = inlined_call_operand.hbm [shape: f32[4,8,128], index: 1, kind: input, shape index: {}]   ;;  %s444_s2 = inlined_call_operand.hbm [shape: f32[2,8,128], index: 2, kind: output, shape index: {0}]   ;;  %s445_s3 = inlined_call_operand.hbm [shape: f32[8,128], index: 3, kind: output, shape index: {1}]   ;;  %s446_s4 = inlined_call_operand.hbm [shape: s8[8,128], index: 4, kind: output, shape index: {2}]  }
   0x1   :  { %s193_s17 = scalar_lea.hbm %s442_s0, 64 }
   0x2   :  { %p194_p0 = scmp.ne.s32.totalorder %s442_s0, %s193_s17  ;;  %p197_p1 = scmp.lt.u32.totalorder %s193_s17, %s442_s0 }
   0x4   :  { %p199_p2 = pnand %p197_p1, %p194_p0 }
   0x6   :  { %202 = shalt.err (!%p199_p2)  }
   0x7   :  { %s299_s22 = smov [#allocation3]  }
   0x8   :  { %11 = dma.hbm_to_smem %s442_s0, 64, %s299_s22, [#allocation2] }
   0x9   :  { %291 = dma.done.wait [#allocation2], 64 }
   0xa   :  { %292 = vsyncadd [#allocation2], 4294967232 }
   0xb   :  { %13 = sfence }
   0xc   :  { %14 = vsyncpa [#allocation5], 0 }
   0xd   :  { %15 = vsyncpa [#allocation6], 0 }
   0xe   :  { %16 = vsyncpa [#allocation9], 0  ;;  %s300_s25 = smov [#allocation4]   ;;  %s203_s29 = scalar_lea.hbm %s443_s1, 512 }
   0xf   :  { %s22_s26 = sshll.u32 %s300_s25, 4  ;;  %p204_p3 = scmp.ne.s32.totalorder %s443_s1, %s203_s29  ;;  %s23_s26 = int_to_ptr.vmem [resolvable:$true] %s22_s26 }
  0x10   :  { %p207_p4 = scmp.lt.u32.totalorder %s203_s29, %s443_s1 }
  0x12   :  { %p209_p5 = pnand %p207_p4, %p204_p3 }
  0x14   :  { %212 = shalt.err (!%p209_p5)
}
  0x15   :  { %s213_s0 = scalar_lea.vmem %s23_s26, 512  ;;  %p218_p7 = scmp.lt.s32.totalorder %s23_s26, %s23_s26 }
  0x16   :  { %p214_p6 = scmp.ne.s32.totalorder %s23_s26, %s213_s0  ;;  %p219_p8 = scmp.lt.s32.totalorder %s213_s0, %s213_s0 }
  0x18   :  { %p220_p9 = por %p219_p8, %p218_p7 }
  0x1a   :  { %p221_p10 = pnand %p220_p9, %p214_p6 }
  0x1c   :  { %224 = shalt.err (!%p221_p10)
}
  0x1d   :  { %s301_s8 = smov 128   ;;  %s302_s9 = smov 8  }
  0x1e   :  { %28 = dma.hbm_to_vmem [thread:$0]  %s443_s1, 512, %s23_s26, [#allocation5], %s301_s8, %s301_s8, %s302_s9  }
  0x1f   :  { %293 = dma.done.wait [#allocation5], 512  }
  0x20   :  { %294 = vsyncadd [#allocation5], 4294966784  ;;  %s175_s12 = sld [smem:[#allocation3 + $0x2]]  ;;  %s179_s16 = sld [smem:[#allocation3 + $0x3]]  ;;  %v34_v0 = vld [vmem:[#allocation4] sm:$0xff]  ;;  %v36_v1 = vld [vmem:[#allocation4 + $0x8] sm:$0xff] }
  0x21   :  { %s176_s13 = sld [smem:[#allocation3 + $0x82]]  ;;  %s180_s17 = sld [smem:[#allocation3 + $0x83]]  ;;  %v38_v4 = vld [vmem:[#allocation4 + $0x10] sm:$0xff]  ;;  %v359_v5 = vld [vmem:[#allocation4 + $0x18] sm:$0xff] }
  0x22   :  { %s177_s14 = sld [smem:[#allocation3 + $0x102]]  ;;  %s181_s18 = sld [smem:[#allocation3 + $0x103]] }
  0x23   :  { %s178_s15 = sld [smem:[#allocation3 + $0x182]]  ;;  %s182_s19 = sld [smem:[#allocation3 + $0x183]] }
  0x24   :  { %s361_s1 = sld [smem:[#allocation3]]  ;;  %s366_s21 = sld [smem:[#allocation3 + $0x1]] }
  0x25   :  { %s363_s20 = sld [smem:[#allocation3 + $0x80]]  ;;  %s368_s22 = sld [smem:[#allocation3 + $0x81]] }
  0x26   :  { %v72_v2 = vstv %s175_s12  ;;  %v87_v12 = vstv %s179_s16  ;;  %s303_s23 = smov [#allocation8]   ;;  %s371_s25 = sld [smem:[#allocation3 + $0x100]] }
  0x27   :  { %v75_v3 = vstv %s176_s13  ;;  %v73_v6 = vmul.f32 %v72_v2, %v34_v0  ;;  %v90_v13 = vstv %s180_s17  ;;  %v88_v15 = vmul.f32 %v87_v12, %v34_v0  ;;  %s142_s24 = sshll.u32 %s303_s23, 4  ;;  %s373_s26 = sld [smem:[#allocation3 + $0x101]]  ;;  %s143_s24 = int_to_ptr.vmem [resolvable:$true] %s142_s24 }
  0x28   :  { %v76_v7 = vmul.f32 %v75_v3, %v36_v1  ;;  %v79_v8 = vstv %s177_s14  ;;  %v91_v16 = vmul.f32 %v90_v13, %v36_v1  ;;  %v94_v17 = vstv %s181_s18  ;;  %s379_s27 = sld [smem:[#allocation3 + $0x180]]  ;;  %s381_s28 = sld [smem:[#allocation3 + $0x181]] }
  0x29   :  { %v83_v9 = vstv %s178_s15  ;;  %v80_v10 = vmul.f32 %v79_v8, %v38_v4  ;;  %v95_v18 = vmul.f32 %v94_v17, %v38_v4  ;;  %v98_v19 = vstv %s182_s19  ;;  %s225_s29 = scalar_lea.vmem %s143_s24, 128  ;;  %p230_p12 = scmp.lt.s32.totalorder %s143_s24, %s143_s24 }
  0x2a   :  { %v84_v11 = vmul.f32 %v83_v9, %v359_v5  ;;  %v77_v14 = vadd.f32 %v76_v7, %v73_v6  ;;  %v99_v21 = vmul.f32 %v98_v19, %v359_v5  ;;  %v92_v22 = vadd.f32 %v91_v16, %v88_v15  ;;  %p226_p11 = scmp.ne.s32.totalorder %s143_s24, %s225_s29  ;;  %p231_p13 = scmp.lt.s32.totalorder %s225_s29, %s225_s29 }
  0x2b   :  { %v42_v25 = vstv %s361_s1  ;;  %v45_v26 = vstv %s363_s20  ;;  %v57_v28 = vstv %s366_s21  ;;  %v60_v29 = vstv %s368_s22 }
  0x2c   :  { %v81_v20 = vadd.f32 %v80_v10, %v77_v14  ;;  %v96_v24 = vadd.f32 %v95_v18, %v92_v22  ;;  %p232_p0 = por %p231_p13, %p230_p12 }
  0x2e   :  { %v375_v23 = vadd.f32 %v84_v11, %v81_v20  ;;  %v100_v27 = vadd.f32 %v99_v21, %v96_v24  ;;  %p233_p1 = pnand %p232_p0, %p226_p11 }
  0x30   :  { %119 = vst [vmem:[#allocation8] sm:$0xff] %v375_v23 }
  0x31   :  { %236 = shalt.err (!%p233_p1)
}
  0x32   :  { %s237_s6 = scalar_lea.hbm %s445_s3, 128 }
  0x33   :  { %p238_p2 = scmp.ne.s32.totalorder %s445_s3, %s237_s6  ;;  %p241_p3 = scmp.lt.u32.totalorder %s237_s6, %s445_s3 }
  0x35   :  { %p243_p4 = pnand %p241_p3, %p238_p2 }
  0x37   :  { %246 = shalt.err (!%p243_p4)
}
  0x38   :  { %145 = dma.vmem_to_hbm [thread:$0]  %s143_s24, 128, %s445_s3, [#allocation9]   ;;  %191 = vrcp.f32 %v100_v27  ;;  %v43_v30 = vmul.f32 %v42_v25, %v34_v0  ;;  %v46_v31 = vmul.f32 %v45_v26, %v36_v1  ;;  %v58_v32 = vmul.f32 %v57_v28, %v34_v0 }
  0x39   :  { %v61_v33 = vmul.f32 %v60_v29, %v36_v1  ;;  %v49_v34 = vstv %s371_s25  ;;  %v64_v35 = vstv %s373_s26  ;;  %v53_v40 = vstv %s379_s27  ;;  %s304_s3 = smov [#allocation7]  }
  0x3a   :  { %v47_v36 = vadd.f32 %v46_v31, %v43_v30  ;;  %v50_v37 = vmul.f32 %v49_v34, %v38_v4  ;;  %v65_v39 = vmul.f32 %v64_v35, %v38_v4  ;;  %v68_v41 = vstv %s381_s28  ;;  %s129_s14 = sshll.u32 %s304_s3, 4  ;;  %s130_s14 = int_to_ptr.vmem [resolvable:$true] %s129_s14 }
  0x3b   :  { %v62_v38 = vadd.f32 %v61_v33, %v58_v32  ;;  %v54_v43 = vmul.f32 %v53_v40, %v359_v5  ;;  %v69_v45 = vmul.f32 %v68_v41, %v359_v5  ;;  %vm114_vm5 = vcmp.gt.f32.partialorder %v375_v23, 0.01  ;;  %s247_s15 = scalar_lea.vmem %s130_s14, 256  ;;  %p252_p6 = scmp.lt.s32.totalorder %s130_s14, %s130_s14 }
  0x3c   :  { %v51_v42 = vadd.f32 %v50_v37, %v47_v36  ;;  %p248_p5 = scmp.ne.s32.totalorder %s130_s14, %s247_s15  ;;  %p253_p7 = scmp.lt.s32.totalorder %s247_s15, %s247_s15 }
  0x3d   :  { %v66_v44 = vadd.f32 %v65_v39, %v62_v38 }
  0x3e   :  { %v55_v48 = vadd.f32 %v54_v43, %v51_v42  ;;  %p254_p8 = por %p253_p7, %p252_p6 }
  0x3f   :  { %v70_v50 = vadd.f32 %v69_v45, %v66_v44 }
  0x40   :  { %p255_p9 = pnand %p254_p8, %p248_p5 }
  0x42   :  { %v192_v46 = vpop.eup %191 }
  0x43   :  { %v102_v47 = vmul.f32 %v192_v46, %v100_v27 }
  0x45   :  { %v103_v49 = vsub.f32 2.0, %v102_v47 }
  0x47   :  { %v104_v51 = vmul.f32 %v192_v46, %v103_v49 }
  0x49   :  { %v105_v52 = vmul.f32 %v104_v51, %v55_v48  ;;  %v106_v53 = vmul.f32 %v104_v51, %v70_v50 }
  0x4b   :  { %116 = vst [vmem:[#allocation7] sm:$0xff] %v105_v52  ;;  %118 = vst [vmem:[#allocation7 + $0x8] sm:$0xff] %v106_v53  ;;  %vm107_vm0 = vcmp.gt.f32.partialorder %v105_v52, 0.0  ;;  %vm108_vm1 = vcmp.lt.f32.partialorder %v105_v52, 1.0  ;;  %vm110_vm2 = vcmp.gt.f32.partialorder %v106_v53, 0.0  ;;  %vm112_vm3 = vcmp.lt.f32.partialorder %v106_v53, 1.0 }
  0x4c   :  { %vm404_vm4 = vmand %vm107_vm0, %vm108_vm1 }
  0x4d   :  { %258 = shalt.err (!%p255_p9)
}
  0x4e   :  { %s259_s18 = scalar_lea.hbm %s444_s2, 256 }
  0x4f   :  { %p260_p10 = scmp.ne.s32.totalorder %s444_s2, %s259_s18  ;;  %p263_p11 = scmp.lt.u32.totalorder %s259_s18, %s444_s2 }
  0x51   :  { %p265_p12 = pnand %p263_p11, %p260_p10 }
  0x53   :  { %268 = shalt.err (!%p265_p12)
}
  0x54   :  { %135 = dma.vmem_to_hbm [thread:$0]  %s130_s14, 256, %s444_s2, [#allocation6], %s301_s8, %s301_s8, %s302_s9   ;;  %vm111_vm6 = vmand %vm404_vm4, %vm110_vm2  ;;  %v306_v55 = vmov 0  }
  0x55   :  { %vm113_vm7 = vmand %vm111_vm6, %vm112_vm3  ;;  %s305_s24 = smov [#allocation10]  }
  0x56   :  { %s152_s25 = sshll.u32 %s305_s24, 4  ;;  %vm115_vm8 = vmand %vm113_vm7, %vm114_vm5  ;;  %s153_s25 = int_to_ptr.vmem [resolvable:$true] %s152_s25 }
  0x57   :  { %vm120_vm9 = vmpackc.low %vm115_vm8, %vm115_vm8  ;;  %s269_s26 = scalar_lea.vmem %s153_s25, 32  ;;  %p274_p0 = scmp.lt.s32.totalorder %s153_s25, %s153_s25 }
  0x58   :  { %vm121_vm10 = vmpackc.even %vm120_vm9, %vm120_vm9  ;;  %p270_p13 = scmp.ne.s32.totalorder %s153_s25, %s269_s26  ;;  %p275_p1 = scmp.lt.s32.totalorder %s269_s26, %s269_s26 }
  0x59   :  { %v122_v56 = vsel %vm121_vm10, 16843009, %v306_v55 }
  0x5a   :  { %123 = vst [vmem:[#allocation10] sm:$0x3] %v122_v56  ;;  %p276_p2 = por %p275_p1, %p274_p0 }
  0x5c   :  { %p277_p3 = pnand %p276_p2, %p270_p13 }
  0x5e   :  { %280 = shalt.err (!%p277_p3)
}
  0x5f   :  { %s281_s9 = scalar_lea.hbm %s446_s4, 32 }
  0x60   :  { %p282_p4 = scmp.ne.s32.totalorder %s446_s4, %s281_s9  ;;  %p285_p5 = scmp.lt.u32.totalorder %s281_s9, %s446_s4 }
  0x62   :  { %p287_p6 = pnand %p285_p5, %p282_p4 }
  0x64   :  { %290 = shalt.err (!%p287_p6)
}
  0x65   :  { %155 = dma.vmem_to_hbm [thread:$0]  %s153_s25, 32, %s446_s4, [#allocation9]  }
  0x66   :  { %295 = dma.done.wait [#allocation6], 256  }
  0x67   :  { %296 = vsyncadd [#allocation6], 4294967040 }
  0x68   :  { %297 = dma.done.wait [#allocation9], 160  }
  0x69   :  { %298 = vsyncadd [#allocation9], 4294967136 }
  0x6a   :  { %165 = vsyncpa [#allocation5], 1 }
  0x6b   :  { %166 = vsyncpa [#allocation6], 1 }
  0x6c   :  { %167 = vsyncpa [#allocation9], 1 }

</bundles_post_ra>
